<compile_context>
chip_gen: v5e
topology: v5e:2x2
jax: 0.10.0
libtpu: 0.0.40
codegen_flags: <defaults>
</compile_context>

<pallas_src>
import functools

import jax
import jax.numpy as jnp
import numpy as np
from jax.experimental import pallas as pl
from jax.experimental.pallas import tpu as pltpu

BN_EPS = 1e-5


def _round_up(x, m):
    return (x + m - 1) // m * m


def mlp2_kernel(x_ref, w1_ref, b1_ref, gamma_ref, beta_ref, w2_ref, b2_ref,
                o_ref, sum_ref, sumsq_ref, *, n_rows, tile_n, bn_eps):
    p = pl.program_id(0)  # 0 = statistics pass, 1 = output pass
    t = pl.program_id(1)  # N-tile index

    # Layer 0: [tile_n, IN_P] @ [IN_P, HID_P] + [1, HID_P]  (MXU, f32 accumulate).
    # Recomputed in both passes; keeps the [N, hid] intermediate out of HBM.
    h = jnp.dot(x_ref[...], w1_ref[...], preferred_element_type=jnp.float32)
    h = h + b1_ref[...]

    @pl.when(p == 0)
    def _stats_pass():
        @pl.when(t == 0)
        def _init():
            sum_ref[...] = jnp.zeros_like(sum_ref)
            sumsq_ref[...] = jnp.zeros_like(sumsq_ref)

        # Mask rows that were added by padding N up to a multiple of tile_n.
        row = t * tile_n + jax.lax.broadcasted_iota(jnp.int32, (tile_n, 1), 0)
        hm = jnp.where(row < n_rows, h, 0.0)
        # One-pass stats: sum and sum of squares (var = E[h^2] - mean^2).
        sum_ref[...] += jnp.sum(hm, axis=0, keepdims=True)
        sumsq_ref[...] += jnp.sum(hm * hm, axis=0, keepdims=True)

    @pl.when(p == 1)
    def _output_pass():
        inv_n = 1.0 / n_rows
        mean = sum_ref[...] * inv_n                                   # [1, HID_P]
        var = jnp.maximum(sumsq_ref[...] * inv_n - mean * mean, 0.0)  # biased var
        inv_std = jax.lax.rsqrt(var + bn_eps)
        hn = (h - mean) * (inv_std * gamma_ref[...]) + beta_ref[...]
        a = jnp.maximum(hn, 0.0).astype(w2_ref.dtype)
        # Layer 1: [tile_n, HID_P] @ [HID_P, OUT_P] + [1, OUT_P]  (lane-dense store).
        out = jnp.dot(a, w2_ref[...], preferred_element_type=jnp.float32)
        o_ref[...] = (out + b2_ref[...]).astype(o_ref.dtype)


def mlp2_forward(x, w1, b1, gamma, beta, w2, b2, *,
                 tile_n=1024, mxu_dtype=jnp.bfloat16, bn_eps=BN_EPS):
    """x: [N, in_dim]; w1: [in_dim, hid]; w2: [hid, out]; b/gamma/beta: [1, dim]."""
    N, in_dim = x.shape
    hid_dim = w1.shape[1]
    out_dim = w2.shape[1]

    # Pad every feature dim to the 128-lane width; pad N to a tile multiple.
    in_p = _round_up(in_dim, 128)
    hid_p = _round_up(hid_dim, 128)
    out_p = _round_up(out_dim, 128)
    tile_n = _round_up(max(8, min(tile_n, _round_up(N, 8))), 8)
    n_p = _round_up(N, tile_n)
    num_tiles = n_p // tile_n

    def pad2(a, rows, cols, dtype, fill=0.0):
        a = jnp.asarray(a, jnp.float32)
        a = jnp.pad(a, ((0, rows - a.shape[0]), (0, cols - a.shape[1])),
                    constant_values=fill)
        return a.astype(dtype)

    xp = pad2(x, n_p, in_p, mxu_dtype)          # MXU operand (bf16 on v6e/v7x path)
    w1p = pad2(w1, in_p, hid_p, mxu_dtype)
    w2p = pad2(w2, hid_p, out_p, mxu_dtype)
    b1p = pad2(b1.reshape(1, -1), 1, hid_p, jnp.float32)
    gp = pad2(gamma.reshape(1, -1), 1, hid_p, jnp.float32, fill=1.0)
    bp = pad2(beta.reshape(1, -1), 1, hid_p, jnp.float32)
    b2p = pad2(b2.reshape(1, -1), 1, out_p, jnp.float32)

    itemsize = jnp.dtype(mxu_dtype).itemsize
    flops = 4 * n_p * in_p * hid_p + 2 * n_p * hid_p * out_p
    bytes_accessed = (2 * n_p * in_p * itemsize          # x read in both passes
                      + (in_p * hid_p + hid_p * out_p) * itemsize
                      + (3 * hid_p + 2 * out_p) * 4
                      + n_p * out_p * 4)                 # output write
    cost = pl.CostEstimate(flops=flops, transcendentals=0,
                           bytes_accessed=bytes_accessed)

    kernel = functools.partial(mlp2_kernel, n_rows=N, tile_n=tile_n, bn_eps=bn_eps)

    grid_spec = pltpu.PrefetchScalarGridSpec(
        num_scalar_prefetch=0,
        grid=(2, num_tiles),  # (pass, N tile)
        in_specs=[
            pl.BlockSpec((tile_n, in_p), lambda p, t: (t, 0)),   # x tile
            pl.BlockSpec((in_p, hid_p), lambda p, t: (0, 0)),    # W1 (resident)
            pl.BlockSpec((1, hid_p), lambda p, t: (0, 0)),       # b1
            pl.BlockSpec((1, hid_p), lambda p, t: (0, 0)),       # gamma
            pl.BlockSpec((1, hid_p), lambda p, t: (0, 0)),       # beta
            pl.BlockSpec((hid_p, out_p), lambda p, t: (0, 0)),   # W2 (resident)
            pl.BlockSpec((1, out_p), lambda p, t: (0, 0)),       # b2
        ],
        # Pass 0 pins the output window at block 0 (never written there, never
        # flushed); pass 1 visits block t and fully writes it before writeback.
        out_specs=pl.BlockSpec((tile_n, out_p), lambda p, t: (t * p, 0)),
        scratch_shapes=[pltpu.VMEM((1, hid_p), jnp.float32),   # per-feature sum
                        pltpu.VMEM((1, hid_p), jnp.float32)],  # per-feature sumsq
    )

    out_padded = pl.pallas_call(
        kernel,
        grid_spec=grid_spec,
        out_shape=jax.ShapeDtypeStruct((n_p, out_p), jnp.float32),
        compiler_params=pltpu.CompilerParams(
            # Both axes sequential: BN stats accumulate across N tiles and the
            # output pass must observe the completed statistics.
            dimension_semantics=("arbitrary", "arbitrary")),
        cost_estimate=cost,
    )(xp, w1p, b1p, gp, bp, w2p, b2p)

    return out_padded[:N, :out_dim]


def mlp2_reference(x, w1, b1, gamma, beta, w2, b2):
    h = x @ w1 + b1
    mean = h.mean(axis=0, keepdims=True)
    var = ((h - mean) ** 2).mean(axis=0, keepdims=True)
    hn = (h - mean) / jnp.sqrt(var + BN_EPS) * gamma + beta
    a = jnp.maximum(hn, 0.0)
    return a @ w2 + b2


if __name__ == "__main__":
    # Small shapes consistent with MLP2(in_dim, hid_dim, out_dim, num_layers=2).
    N, in_dim, hid_dim, out_dim = 64, 16, 32, 8

    key = jax.random.PRNGKey(0)
    kx, kw1, kb1, kw2, kb2 = jax.random.split(key, 5)

    x = jax.random.normal(kx, (N, in_dim), dtype=jnp.float32)

    # Deterministic parameter init (Kaiming-uniform-ish bounds like nn.Linear).
    lim1 = 1.0 / np.sqrt(in_dim)
    lim2 = 1.0 / np.sqrt(hid_dim)
    w1 = jax.random.uniform(kw1, (in_dim, hid_dim), jnp.float32, -lim1, lim1)  # [in, out] layout
    b1 = jax.random.uniform(kb1, (1, hid_dim), jnp.float32, -lim1, lim1)
    w2 = jax.random.uniform(kw2, (hid_dim, out_dim), jnp.float32, -lim2, lim2)
    b2 = jax.random.uniform(kb2, (1, out_dim), jnp.float32, -lim2, lim2)
    gamma = jnp.ones((1, hid_dim), jnp.float32)   # BatchNorm1d weight init
    beta = jnp.zeros((1, hid_dim), jnp.float32)   # BatchNorm1d bias init

    ref = mlp2_reference(x, w1, b1, gamma, beta, w2, b2)

    # 1) Bit-faithful path: f32 MXU operands, tight tolerance.
    out_f32 = jax.block_until_ready(
        mlp2_forward(x, w1, b1, gamma, beta, w2, b2, mxu_dtype=jnp.float32))
    np.testing.assert_allclose(np.asarray(out_f32), np.asarray(ref),
                               rtol=1e-4, atol=1e-4)

    # 2) Fast path: bf16 MXU operands (f32 accumulate, f32 BN math), looser tol.
    out_bf16 = jax.block_until_ready(
        mlp2_forward(x, w1, b1, gamma, beta, w2, b2, mxu_dtype=jnp.bfloat16))
    np.testing.assert_allclose(np.asarray(out_bf16), np.asarray(ref),
                               rtol=5e-2, atol=5e-2)

    # 3) Multi-tile + row-masking path: N not a multiple of the tile, 4 N-tiles.
    x60 = x[:60]
    ref60 = mlp2_reference(x60, w1, b1, gamma, beta, w2, b2)
    out60 = jax.block_until_ready(
        mlp2_forward(x60, w1, b1, gamma, beta, w2, b2,
                     tile_n=16, mxu_dtype=jnp.float32))
    np.testing.assert_allclose(np.asarray(out60), np.asarray(ref60),
                               rtol=1e-4, atol=1e-4)

    print("KERNEL_OK")
</pallas_src>

<mosaic_0001>
module attributes {stable_mosaic.version = 11 : i64} {
  func.func @mlp2_kernel(%arg0: i32, %arg1: i32, %arg2: memref<64x128xf32, #tpu.memory_space<vmem>>, %arg3: memref<128x128xf32, #tpu.memory_space<vmem>>, %arg4: memref<1x128xf32, #tpu.memory_space<vmem>>, %arg5: memref<1x128xf32, #tpu.memory_space<vmem>>, %arg6: memref<1x128xf32, #tpu.memory_space<vmem>>, %arg7: memref<128x128xf32, #tpu.memory_space<vmem>>, %arg8: memref<1x128xf32, #tpu.memory_space<vmem>>, %arg9: memref<64x128xf32, #tpu.memory_space<vmem>>, %arg10: memref<1x128xf32, #tpu.memory_space<vmem>>, %arg11: memref<1x128xf32, #tpu.memory_space<vmem>>) attributes {dimension_semantics = [#tpu.dimension_semantics<arbitrary>, #tpu.dimension_semantics<arbitrary>], iteration_bounds = array<i64: 2, 1>, scalar_prefetch = 0 : i64, scratch_operands = 2 : i64, tpu.core_type = #tpu.core_type<tc>, window_params = [{transform_indices = @transform_0, window_bounds = array<i64: 64, 128>}, {pipeline_mode = #tpu.pipeline_mode<synchronous>, transform_indices = @transform_1, window_bounds = array<i64: 128, 128>}, {pipeline_mode = #tpu.pipeline_mode<synchronous>, transform_indices = @transform_2, window_bounds = array<i64: 1, 128>}, {pipeline_mode = #tpu.pipeline_mode<synchronous>, transform_indices = @transform_3, window_bounds = array<i64: 1, 128>}, {pipeline_mode = #tpu.pipeline_mode<synchronous>, transform_indices = @transform_4, window_bounds = array<i64: 1, 128>}, {pipeline_mode = #tpu.pipeline_mode<synchronous>, transform_indices = @transform_5, window_bounds = array<i64: 128, 128>}, {pipeline_mode = #tpu.pipeline_mode<synchronous>, transform_indices = @transform_6, window_bounds = array<i64: 1, 128>}, {transform_indices = @transform_7, window_bounds = array<i64: 64, 128>}]} {
    %c0 = arith.constant 0 : index
    %c0_0 = arith.constant 0 : index
    %0 = vector.load %arg2[%c0, %c0_0] : memref<64x128xf32, #tpu.memory_space<vmem>>, vector<64x128xf32>
    %c0_1 = arith.constant 0 : index
    %c0_2 = arith.constant 0 : index
    %1 = vector.load %arg3[%c0_1, %c0_2] : memref<128x128xf32, #tpu.memory_space<vmem>>, vector<128x128xf32>
    %cst = arith.constant dense<0.000000e+00> : vector<64x128xf32>
    %2 = tpu.matmul %0, %1, %cst {dimension_numbers = #tpu.dot_dimension_numbers<[1], [0], [0], [1], [0, 0, 1, 1], [], []>} : vector<64x128xf32>, vector<128x128xf32>, vector<64x128xf32> -> vector<64x128xf32>
    %c0_3 = arith.constant 0 : index
    %c0_4 = arith.constant 0 : index
    %3 = vector.load %arg4[%c0_3, %c0_4] : memref<1x128xf32, #tpu.memory_space<vmem>>, vector<1x128xf32>
    %4 = vector.broadcast %3 : vector<1x128xf32> to vector<64x128xf32>
    %5 = arith.addf %2, %4 : vector<64x128xf32>
    %c0_i32 = arith.constant 0 : i32
    %6 = arith.cmpi eq, %arg0, %c0_i32 : i32
    %7 = arith.extui %6 : i1 to i32
    %c0_i32_5 = arith.constant 0 : i32
    %8 = arith.cmpi ne, %7, %c0_i32_5 : i32
    scf.if %8 {
      %c0_i32_7 = arith.constant 0 : i32
      %12 = arith.cmpi eq, %arg1, %c0_i32_7 : i32
      %13 = arith.extui %12 : i1 to i32
      %c0_i32_8 = arith.constant 0 : i32
      %14 = arith.cmpi ne, %13, %c0_i32_8 : i32
      scf.if %14 {
        %cst_21 = arith.constant 0.000000e+00 : f32
        %36 = vector.broadcast %cst_21 : f32 to vector<1x128xf32>
        %c0_22 = arith.constant 0 : index
        %c0_23 = arith.constant 0 : index
        %37 = vector.load %arg10[%c0_22, %c0_23] : memref<1x128xf32, #tpu.memory_space<vmem>>, vector<1x128xf32>
        tpu.vector_store %arg10[%c0_22, %c0_23], %36 {strides = array<i32>} : memref<1x128xf32, #tpu.memory_space<vmem>>, vector<1x128xf32>,
        %cst_24 = arith.constant 0.000000e+00 : f32
        %38 = vector.broadcast %cst_24 : f32 to vector<1x128xf32>
        %c0_25 = arith.constant 0 : index
        %c0_26 = arith.constant 0 : index
        %39 = vector.load %arg11[%c0_25, %c0_26] : memref<1x128xf32, #tpu.memory_space<vmem>>, vector<1x128xf32>
        tpu.vector_store %arg11[%c0_25, %c0_26], %38 {strides = array<i32>} : memref<1x128xf32, #tpu.memory_space<vmem>>, vector<1x128xf32>,
      } else {
      }
      %c64_i32 = arith.constant 64 : i32
      %15 = arith.muli %arg1, %c64_i32 : i32
      %16 = tpu.iota {dimensions = array<i32: 0>} : vector<64x1xi32>
      %17 = vector.broadcast %15 : i32 to vector<64x1xi32>
      %18 = arith.addi %17, %16 : vector<64x1xi32>
      %c64_i32_9 = arith.constant 64 : i32
      %19 = vector.broadcast %c64_i32_9 : i32 to vector<64x1xi32>
      %20 = arith.cmpi slt, %18, %19 : vector<64x1xi32>
      %cst_10 = arith.constant 0.000000e+00 : f32
      %21 = vector.shape_cast %20 : vector<64x1xi1> to vector<64x1xi1>
      %22 = vector.broadcast %21 : vector<64x1xi1> to vector<64x128xi1>
      %23 = vector.broadcast %cst_10 : f32 to vector<64x128xf32>
      %24 = arith.select %22, %5, %23 : vector<64x128xi1>, vector<64x128xf32>
      %c0_11 = arith.constant 0 : index
      %c0_12 = arith.constant 0 : index
      %25 = vector.load %arg10[%c0_11, %c0_12] : memref<1x128xf32, #tpu.memory_space<vmem>>, vector<1x128xf32>
      %cst_13 = arith.constant dense<0.000000e+00> : vector<128xf32>
      %26 = vector.multi_reduction <add>, %24, %cst_13 [0] : vector<64x128xf32> to vector<128xf32>
      %27 = vector.shape_cast %26 : vector<128xf32> to vector<1x128xf32>
      %28 = arith.addf %25, %27 : vector<1x128xf32>
      %c0_14 = arith.constant 0 : index
      %c0_15 = arith.constant 0 : index
      %29 = vector.load %arg10[%c0_14, %c0_15] : memref<1x128xf32, #tpu.memory_space<vmem>>, vector<1x128xf32>
      tpu.vector_store %arg10[%c0_14, %c0_15], %28 {strides = array<i32>} : memref<1x128xf32, #tpu.memory_space<vmem>>, vector<1x128xf32>,
      %c0_16 = arith.constant 0 : index
      %c0_17 = arith.constant 0 : index
      %30 = vector.load %arg11[%c0_16, %c0_17] : memref<1x128xf32, #tpu.memory_space<vmem>>, vector<1x128xf32>
      %31 = arith.mulf %24, %24 : vector<64x128xf32>
      %cst_18 = arith.constant dense<0.000000e+00> : vector<128xf32>
      %32 = vector.multi_reduction <add>, %31, %cst_18 [0] : vector<64x128xf32> to vector<128xf32>
      %33 = vector.shape_cast %32 : vector<128xf32> to vector<1x128xf32>
      %34 = arith.addf %30, %33 : vector<1x128xf32>
      %c0_19 = arith.constant 0 : index
      %c0_20 = arith.constant 0 : index
      %35 = vector.load %arg11[%c0_19, %c0_20] : memref<1x128xf32, #tpu.memory_space<vmem>>, vector<1x128xf32>
      tpu.vector_store %arg11[%c0_19, %c0_20], %34 {strides = array<i32>} : memref<1x128xf32, #tpu.memory_space<vmem>>, vector<1x128xf32>,
    } else {
    }
    %c1_i32 = arith.constant 1 : i32
    %9 = arith.cmpi eq, %arg0, %c1_i32 : i32
    %10 = arith.extui %9 : i1 to i32
    %c0_i32_6 = arith.constant 0 : i32
    %11 = arith.cmpi ne, %10, %c0_i32_6 : i32
    scf.if %11 {
      %c0_7 = arith.constant 0 : index
      %c0_8 = arith.constant 0 : index
      %12 = vector.load %arg10[%c0_7, %c0_8] : memref<1x128xf32, #tpu.memory_space<vmem>>, vector<1x128xf32>
      %cst_9 = arith.constant 1.562500e-02 : f32
      %13 = vector.broadcast %cst_9 : f32 to vector<1x128xf32>
      %14 = arith.mulf %12, %13 : vector<1x128xf32>
      %c0_10 = arith.constant 0 : index
      %c0_11 = arith.constant 0 : index
      %15 = vector.load %arg11[%c0_10, %c0_11] : memref<1x128xf32, #tpu.memory_space<vmem>>, vector<1x128xf32>
      %cst_12 = arith.constant 1.562500e-02 : f32
      %16 = vector.broadcast %cst_12 : f32 to vector<1x128xf32>
      %17 = arith.mulf %15, %16 : vector<1x128xf32>
      %18 = arith.mulf %14, %14 : vector<1x128xf32>
      %19 = arith.subf %17, %18 : vector<1x128xf32>
      %cst_13 = arith.constant 0.000000e+00 : f32
      %20 = vector.broadcast %cst_13 : f32 to vector<1x128xf32>
      %21 = arith.maximumf %19, %20 : vector<1x128xf32>
      %cst_14 = arith.constant 9.99999974E-6 : f32
      %22 = vector.broadcast %cst_14 : f32 to vector<1x128xf32>
      %23 = arith.addf %21, %22 : vector<1x128xf32>
      %24 = math.rsqrt %23 : vector<1x128xf32>
      %25 = vector.broadcast %14 : vector<1x128xf32> to vector<64x128xf32>
      %26 = arith.subf %5, %25 : vector<64x128xf32>
      %c0_15 = arith.constant 0 : index
      %c0_16 = arith.constant 0 : index
      %27 = vector.load %arg5[%c0_15, %c0_16] : memref<1x128xf32, #tpu.memory_space<vmem>>, vector<1x128xf32>
      %28 = arith.mulf %24, %27 : vector<1x128xf32>
      %29 = vector.broadcast %28 : vector<1x128xf32> to vector<64x128xf32>
      %30 = arith.mulf %26, %29 : vector<64x128xf32>
      %c0_17 = arith.constant 0 : index
      %c0_18 = arith.constant 0 : index
      %31 = vector.load %arg6[%c0_17, %c0_18] : memref<1x128xf32, #tpu.memory_space<vmem>>, vector<1x128xf32>
      %32 = vector.broadcast %31 : vector<1x128xf32> to vector<64x128xf32>
      %33 = arith.addf %30, %32 : vector<64x128xf32>
      %cst_19 = arith.constant 0.000000e+00 : f32
      %34 = vector.broadcast %cst_19 : f32 to vector<64x128xf32>
      %35 = arith.maximumf %33, %34 : vector<64x128xf32>
      %c0_20 = arith.constant 0 : index
      %c0_21 = arith.constant 0 : index
      %36 = vector.load %arg7[%c0_20, %c0_21] : memref<128x128xf32, #tpu.memory_space<vmem>>, vector<128x128xf32>
      %cst_22 = arith.constant dense<0.000000e+00> : vector<64x128xf32>
      %37 = tpu.matmul %35, %36, %cst_22 {dimension_numbers = #tpu.dot_dimension_numbers<[1], [0], [0], [1], [0, 0, 1, 1], [], []>} : vector<64x128xf32>, vector<128x128xf32>, vector<64x128xf32> -> vector<64x128xf32>
      %c0_23 = arith.constant 0 : index
      %c0_24 = arith.constant 0 : index
      %38 = vector.load %arg8[%c0_23, %c0_24] : memref<1x128xf32, #tpu.memory_space<vmem>>, vector<1x128xf32>
      %39 = vector.broadcast %38 : vector<1x128xf32> to vector<64x128xf32>
      %40 = arith.addf %37, %39 : vector<64x128xf32>
      %c0_25 = arith.constant 0 : index
      %c0_26 = arith.constant 0 : index
      %41 = vector.load %arg9[%c0_25, %c0_26] : memref<64x128xf32, #tpu.memory_space<vmem>>, vector<64x128xf32>
      tpu.vector_store %arg9[%c0_25, %c0_26], %40 {strides = array<i32>} : memref<64x128xf32, #tpu.memory_space<vmem>>, vector<64x128xf32>,
    } else {
    }
    return
  }
  func.func @transform_0(%arg0: i32, %arg1: i32) -> (i32, i32) {
    %c0_i32 = arith.constant 0 : i32
    %c0_i32_0 = arith.constant 0 : i32
    return %arg1, %c0_i32 : i32, i32
  }
  func.func @transform_1(%arg0: i32, %arg1: i32) -> (i32, i32) {
    %c0_i32 = arith.constant 0 : i32
    %c0_i32_0 = arith.constant 0 : i32
    %c0_i32_1 = arith.constant 0 : i32
    return %c0_i32, %c0_i32_0 : i32, i32
  }
  func.func @transform_2(%arg0: i32, %arg1: i32) -> (i32, i32) {
    %c0_i32 = arith.constant 0 : i32
    %c0_i32_0 = arith.constant 0 : i32
    %c0_i32_1 = arith.constant 0 : i32
    return %c0_i32, %c0_i32_0 : i32, i32
  }
  func.func @transform_3(%arg0: i32, %arg1: i32) -> (i32, i32) {
    %c0_i32 = arith.constant 0 : i32
    %c0_i32_0 = arith.constant 0 : i32
    %c0_i32_1 = arith.constant 0 : i32
    return %c0_i32, %c0_i32_0 : i32, i32
  }
  func.func @transform_4(%arg0: i32, %arg1: i32) -> (i32, i32) {
    %c0_i32 = arith.constant 0 : i32
    %c0_i32_0 = arith.constant 0 : i32
    %c0_i32_1 = arith.constant 0 : i32
    return %c0_i32, %c0_i32_0 : i32, i32
  }
  func.func @transform_5(%arg0: i32, %arg1: i32) -> (i32, i32) {
    %c0_i32 = arith.constant 0 : i32
    %c0_i32_0 = arith.constant 0 : i32
    %c0_i32_1 = arith.constant 0 : i32
    return %c0_i32, %c0_i32_0 : i32, i32
  }
  func.func @transform_6(%arg0: i32, %arg1: i32) -> (i32, i32) {
    %c0_i32 = arith.constant 0 : i32
    %c0_i32_0 = arith.constant 0 : i32
    %c0_i32_1 = arith.constant 0 : i32
    return %c0_i32, %c0_i32_0 : i32, i32
  }
  func.func @transform_7(%arg0: i32, %arg1: i32) -> (i32, i32) {
    %0 = arith.muli %arg1, %arg0 : i32
    %c0_i32 = arith.constant 0 : i32
    %c0_i32_0 = arith.constant 0 : i32
    return %0, %c0_i32 : i32, i32
  }
}

</mosaic_0001>

<bundles_post_ra>
// kernel: tpu_custom_call.1
= control target key start
LH: loop header
LB: loop body
LE: loop exit
PB: predicated region body
PF: predicated region fallthrough
CT: control target
= control target key end

     0   :  { %12 = vsyncpa [#allocation5], 0  ;;  %s1286_s0 = inlined_call_operand.hbm [shape: f32[64,128], index: 0, kind: input, shape index: {}]   ;;  %s1287_s1 = inlined_call_operand.hbm [shape: f32[128,128], index: 1, kind: input, shape index: {}]   ;;  %s1288_s2 = inlined_call_operand.vmem [shape: f32[1,128], index: 2, kind: input, shape index: {}]   ;;  %s1289_s3 = inlined_call_operand.vmem [shape: f32[1,128], index: 3, kind: input, shape index: {}]   ;;  %s1290_s4 = inlined_call_operand.vmem [shape: f32[1,128], index: 4, kind: input, shape index: {}]   ;;  %s1291_s5 = inlined_call_operand.hbm [shape: f32[128,128], index: 5, kind: input, shape index: {}]   ;;  %s1292_s6 = inlined_call_operand.vmem [shape: f32[1,128], index: 6, kind: input, shape index: {}]   ;;  %s1293_s7 = inlined_call_operand.hbm [shape: f32[64,128], index: 7, kind: output, shape index: {}]  }
   0x1   :  { %13 = vsyncpa [#allocation8], 0 }
   0x2   :  { %14 = vsyncpa [#allocation6], 0 }
   0x3   :  { %16 = vsyncpa [#allocation6 + $0x1], 0  ;;  %s1137_s24 = smov 0   ;;  %s1139_s25 = smov 0  }
   0x4   :  { %s1141_s26 = smov 0  }
   0x5 LB: > { %s745_s27 = sadd.s32 4294967295, %s1086_s26   ;;  %s746_s28 = sadd.s32 4294967294, %s1086_s26   ;;  %s1086_s26 = sphi %s1141_s26, %s22_s26   ;;  %s1082_s25 = sphi %s1139_s25, %s1298_s25   ;;  %s1078_s24 = sphi %s1137_s24, %s1297_s24  }
   0x6   : > { %p747_p0 = scmp.ge.s32.totalorder %s1086_s26, 1  ;;  %p219_p1 = scmp.lt.s32.totalorder %s1086_s26, 3 }
   0x7   : > { %p1158_p2 = scmp.eq.s32.totalorder %s745_s27, 0  ;;  %s247_s10 = sshll.u32 %s1287_s1, 4  ;;  %s248_s10 = int_to_ptr.hbm [resolvable:$true] %s247_s10 }
   0x8   : > { %p1162_p3 = pnand %p747_p0, %p219_p1  ;;  %s1088_s11 = smov [#allocation7]  }
   0x9   : > { %s249_s12 = sshll.u32 %s1088_s11, 4  ;;  %s34_s14 = sadd.s32 1, %s1082_s25  ;;  %s250_s12 = int_to_ptr.vmem [resolvable:$true] %s249_s12 }
   0xa   : > { %p873_p4 = pneg %p1162_p3  ;;  %s1089_s15 = smov 128  }
   0xb   : > { %s1090_s16 = smov 8   ;;  %p36_p6 = scmp.ge.s32.totalorder %s34_s14, 2 }
   0xc   : > { %p1173_p5 = pnand %p1158_p2, %p873_p4  ;;  %s233_s19 = sshll.u32 %s1286_s0, 4  ;;  %s234_s19 = int_to_ptr.hbm [resolvable:$true] %s233_s19 }
   0xd   : > { %s1300_s14 = smov (%p36_p6, %s34_s14), 0  ;;  %s1091_s20 = smov [#allocation4]  }
   0xe   : > { %879 = dma.hbm_to_vmem [thread:$0]  (!%p1173_p5), %s248_s10, 2048, %s250_s12, [#allocation8], %s1089_s15, %s1089_s15, %s1090_s16  }
   0xf   : > { %s235_s21 = sshll.u32 %s1091_s20, 4  ;;  %s270_s8 = sshll.u32 %s1291_s5, 4  ;;  %s236_s21 = int_to_ptr.vmem [resolvable:$true] %s235_s21  ;;  %s271_s8 = int_to_ptr.hbm [resolvable:$true] %s270_s8 }
  0x10   : > { %876 = dma.hbm_to_vmem [thread:$0]  (!%p1173_p5), %s234_s19, 1024, %s236_s21, [#allocation5], %s1089_s15, %s1089_s15, %s1090_s16  }
  0x11   : > { %s1092_s9 = smov [#allocation9]   ;;  %291 = sbr.rel (%p1162_p3) target bundleno = 424 (0x1a8), region = 48 }
  0x12   : > { %s272_s10 = sshll.u32 %s1092_s9, 4  ;;  %s273_s10 = int_to_ptr.vmem [resolvable:$true] %s272_s10 }
  0x13   : > { %882 = dma.hbm_to_vmem [thread:$0]  (!%p1173_p5), %s271_s8, 2048, %s273_s10, [#allocation8], %s1089_s15, %s1089_s15, %s1090_s16  }
  0x16   : > { %1065 = dma.done.wait (%p1158_p2), [#allocation5], 1024  }
  0x17   : > { %1067 = vsyncadd (%p1158_p2), [#allocation5], 4294966272 }
  0x18   : > { %1069 = dma.done.wait (%p1158_p2), [#allocation8], 4096  }
  0x19   : > { %1071 = vsyncadd (%p1158_p2), [#allocation8], 4294963200  ;;  %v355_v0 = vld [vmem:[#allocation7 + $0x78] sm:$0xff]  ;;  %v354_v1 = vld [vmem:[#allocation7 + $0x70] sm:$0xff]  ;;  %p755_p7 = scmp.ne.s32.totalorder %s1078_s24, 0 }
  0x1a   : > { %762 = vmatpush.msra.mxu2 %v355_v0  ;;  %763 = vmatpush.msra.mxu3 %v355_v0  ;;  %v353_v2 = vld [vmem:[#allocation7 + $0x68] sm:$0xff]  ;;  %v352_v3 = vld [vmem:[#allocation7 + $0x60] sm:$0xff]  ;;  %v351_v4 = vld [vmem:[#allocation7 + $0x58] sm:$0xff] }
  0x1b   : > { %360 = vmatpush.msra.mxu0 %v355_v0  ;;  %761 = vmatpush.msra.mxu1 %v355_v0  ;;  %v350_v5 = vld [vmem:[#allocation7 + $0x50] sm:$0xff]  ;;  %v349_v6 = vld [vmem:[#allocation7 + $0x48] sm:$0xff]  ;;  %v348_v7 = vld [vmem:[#allocation7 + $0x40] sm:$0xff] }
  0x1c   : > { %765 = vmatpush.msra.mxu2 %v354_v1  ;;  %766 = vmatpush.msra.mxu3 %v354_v1  ;;  %v347_v8 = vld [vmem:[#allocation7 + $0x38] sm:$0xff]  ;;  %v346_v9 = vld [vmem:[#allocation7 + $0x30] sm:$0xff]  ;;  %v345_v10 = vld [vmem:[#allocation7 + $0x28] sm:$0xff] }
  0x1d   : > { %361 = vmatpush.msra.mxu0 %v354_v1  ;;  %764 = vmatpush.msra.mxu1 %v354_v1  ;;  %v344_v11 = vld [vmem:[#allocation7 + $0x20] sm:$0xff]  ;;  %v343_v12 = vld [vmem:[#allocation7 + $0x18] sm:$0xff]  ;;  %v342_v13 = vld [vmem:[#allocation7 + $0x10] sm:$0xff] }
  0x1e   : > { %768 = vmatpush.msra.mxu2 %v353_v2  ;;  %769 = vmatpush.msra.mxu3 %v353_v2  ;;  %v341_v14 = vld [vmem:[#allocation7 + $0x8] sm:$0xff]  ;;  %v340_v15 = vld [vmem:[#allocation7] sm:$0xff]  ;;  %v338_v17 = vld [vmem:[#allocation4 + $0x30] sm:$0xff] }
  0x1f   : > { %362 = vmatpush.msra.mxu0 %v353_v2  ;;  %767 = vmatpush.msra.mxu1 %v353_v2  ;;  %v336_v16 = vld [vmem:[#allocation4 + $0x20] sm:$0xff]  ;;  %v334_v19 = vld [vmem:[#allocation4 + $0x10] sm:$0xff]  ;;  %v337_v20 = vld [vmem:[#allocation4 + $0x28] sm:$0xff] }
  0x20   : > { %771 = vmatpush.msra.mxu2 %v352_v3  ;;  %772 = vmatpush.msra.mxu3 %v352_v3  ;;  %v332_v18 = vld [vmem:[#allocation4] sm:$0xff]  ;;  %v339_v21 = vld [vmem:[#allocation4 + $0x38] sm:$0xff]  ;;  %v333_v22 = vld [vmem:[#allocation4 + $0x8] sm:$0xff] }
  0x21   : > { %363 = vmatpush.msra.mxu0 %v352_v3  ;;  %770 = vmatpush.msra.mxu1 %v352_v3  ;;  %v335_v23 = vld [vmem:[#allocation4 + $0x18] sm:$0xff] }
  0x22   : > { %774 = vmatpush.msra.mxu2 %v351_v4  ;;  %775 = vmatpush.msra.mxu3 %v351_v4  ;;  %v929_v24 = vld [vmem:[%s1288_s2] ss:$0 sm:$0xff] }
  0x23   : > { %364 = vmatpush.msra.mxu0 %v351_v4  ;;  %773 = vmatpush.msra.mxu1 %v351_v4 }
  0x24   : > { %777 = vmatpush.msra.mxu2 %v350_v5  ;;  %778 = vmatpush.msra.mxu3 %v350_v5 }
  0x25   : > { %365 = vmatpush.msra.mxu0 %v350_v5  ;;  %776 = vmatpush.msra.mxu1 %v350_v5 }
  0x26   : > { %780 = vmatpush.msra.mxu2 %v349_v6  ;;  %781 = vmatpush.msra.mxu3 %v349_v6 }
  0x27   : > { %366 = vmatpush.msra.mxu0 %v349_v6  ;;  %779 = vmatpush.msra.mxu1 %v349_v6 }
  0x28   : > { %783 = vmatpush.msra.mxu2 %v348_v7  ;;  %784 = vmatpush.msra.mxu3 %v348_v7 }
  0x29   : > { %367 = vmatpush.msra.mxu0 %v348_v7  ;;  %782 = vmatpush.msra.mxu1 %v348_v7 }
  0x2a   : > { %786 = vmatpush.msra.mxu2 %v347_v8  ;;  %787 = vmatpush.msra.mxu3 %v347_v8 }
  0x2b   : > { %368 = vmatpush.msra.mxu0 %v347_v8  ;;  %785 = vmatpush.msra.mxu1 %v347_v8 }
  0x2c   : > { %789 = vmatpush.msra.mxu2 %v346_v9  ;;  %790 = vmatpush.msra.mxu3 %v346_v9 }
  0x2d   : > { %369 = vmatpush.msra.mxu0 %v346_v9  ;;  %788 = vmatpush.msra.mxu1 %v346_v9 }
  0x2e   : > { %792 = vmatpush.msra.mxu2 %v345_v10  ;;  %793 = vmatpush.msra.mxu3 %v345_v10 }
  0x2f   : > { %370 = vmatpush.msra.mxu0 %v345_v10  ;;  %791 = vmatpush.msra.mxu1 %v345_v10 }
  0x30   : > { %795 = vmatpush.msra.mxu2 %v344_v11  ;;  %796 = vmatpush.msra.mxu3 %v344_v11 }
  0x31   : > { %371 = vmatpush.msra.mxu0 %v344_v11  ;;  %794 = vmatpush.msra.mxu1 %v344_v11 }
  0x32   : > { %798 = vmatpush.msra.mxu2 %v343_v12  ;;  %799 = vmatpush.msra.mxu3 %v343_v12 }
  0x33   : > { %372 = vmatpush.msra.mxu0 %v343_v12  ;;  %797 = vmatpush.msra.mxu1 %v343_v12 }
  0x34   : > { %801 = vmatpush.msra.mxu2 %v342_v13  ;;  %802 = vmatpush.msra.mxu3 %v342_v13 }
  0x35   : > { %373 = vmatpush.msra.mxu0 %v342_v13  ;;  %800 = vmatpush.msra.mxu1 %v342_v13 }
  0x36   : > { %804 = vmatpush.msra.mxu2 %v341_v14  ;;  %805 = vmatpush.msra.mxu3 %v341_v14 }
  0x37   : > { %374 = vmatpush.msra.mxu0 %v341_v14  ;;  %803 = vmatpush.msra.mxu1 %v341_v14 }
  0x38   : > { %807 = vmatpush.msra.mxu2 %v340_v15  ;;  %808 = vmatpush.msra.mxu3 %v340_v15 }
  0x39   : > { %388 = vmatmul.f32.vlgmr.msra.gmra.mxu2 %v336_v16  ;;  %394 = vmatmul.f32.vlgmr.msra.gmra.mxu3 %v338_v17 }
  0x3a   : > { %375 = vmatpush.msra.mxu0 %v340_v15  ;;  %806 = vmatpush.msra.mxu1 %v340_v15 }
  0x3b   : > { %376 = vmatmul.f32.vlgmr.msra.gmra.mxu0 %v332_v18  ;;  %382 = vmatmul.f32.vlgmr.msra.gmra.mxu1 %v334_v19 }
  0x41   : > { %391 = vmatmul.f32.gmra.mxu2 %v337_v20  ;;  %397 = vmatmul.f32.gmra.mxu3 %v339_v21 }
  0x43   : > { %379 = vmatmul.f32.gmra.mxu0 %v333_v22  ;;  %385 = vmatmul.f32.gmra.mxu1 %v335_v23 }
  0xb8   : > { %v377_v25 = vpop.f32.mrf.mxu0  ;;  %v383_v26 = vpop.f32.mrf.mxu1 }
  0xb9   : > { %v1205_v27 = vadd.f32 %v929_v24, %v377_v25  ;;  %v1207_v28 = vadd.f32 %v929_v24, %v383_v26 }
  0xbc   : > { %v389_v29 = vpop.f32.mrf.mxu2  ;;  %v395_v30 = vpop.f32.mrf.mxu3 }
  0xbd   : > { %v1209_v31 = vadd.f32 %v929_v24, %v389_v29  ;;  %v1211_v32 = vadd.f32 %v929_v24, %v395_v30 }
  0xc0   : > { %v380_v33 = vpop.f32.mrf.mxu0  ;;  %v386_v34 = vpop.f32.mrf.mxu1 }
  0xc1   : > { %v1213_v35 = vadd.f32 %v929_v24, %v380_v33  ;;  %v1215_v36 = vadd.f32 %v929_v24, %v386_v34  ;;  %404 = sbr.rel (%p755_p7) target bundleno = 229 (0xe5), region = 64 }
  0xc4   : > { %v392_v37 = vpop.f32.mrf.mxu2  ;;  %v398_v38 = vpop.f32.mrf.mxu3 }
  0xc5   : > { %v1217_v39 = vadd.f32 %v929_v24, %v392_v37  ;;  %v1219_v40 = vadd.f32 %v929_v24, %v398_v38 }
  0xc6   : > { %v463_v41 = vadd.f32 %v1213_v35, %v1205_v27  ;;  %v479_v42 = vmul.f32 %v1205_v27, %v1205_v27  ;;  %v480_v43 = vmul.f32 %v1213_v35, %v1213_v35  ;;  %v1093_v44 = vmov 0.0  }
  0xc7   : > { %409 = vst [vmem:[#allocation2] sm:$0x1] %v1093_v44  ;;  %v481_v45 = vmul.f32 %v1207_v28, %v1207_v28  ;;  %v482_v47 = vmul.f32 %v1215_v36, %v1215_v36  ;;  %v483_v50 = vmul.f32 %v1209_v31, %v1209_v31  ;;  %v484_v53 = vmul.f32 %v1217_v39, %v1217_v39 }
  0xc8   : > { %410 = vst [vmem:[#allocation3] sm:$0x1] %v1093_v44  ;;  %v464_v46 = vadd.f32 %v463_v41, %v1207_v28  ;;  %v487_v48 = vadd.f32 %v480_v43, %v479_v42  ;;  %v485_v56 = vmul.f32 %v1211_v32, %v1211_v32  ;;  %v486_v59 = vmul.f32 %v1219_v40, %v1219_v40 }
  0xca   : > { %v465_v49 = vadd.f32 %v464_v46, %v1215_v36  ;;  %v488_v51 = vadd.f32 %v487_v48, %v481_v45 }
  0xcc   : > { %v466_v52 = vadd.f32 %v465_v49, %v1209_v31  ;;  %v489_v54 = vadd.f32 %v488_v51, %v482_v47 }
  0xce   : > { %v467_v55 = vadd.f32 %v466_v52, %v1217_v39  ;;  %v490_v57 = vadd.f32 %v489_v54, %v483_v50  ;;  %v462_v9 = vld [vmem:[#allocation2] sm:$0x1] }
  0xcf   : > { %v478_v12 = vld [vmem:[#allocation3] sm:$0x1] }
  0xd0   : > { %v468_v58 = vadd.f32 %v467_v55, %v1211_v32  ;;  %v491_v60 = vadd.f32 %v490_v57, %v484_v53 }
  0xd2   : > { %v469_v61 = vadd.f32 %v468_v58, %v1219_v40  ;;  %v492_v62 = vadd.f32 %v491_v60, %v485_v56 }
  0xd4   : > { %v470_v63 = vrot.slane %v469_v61, 4  ;;  %v493_v0 = vadd.f32 %v492_v62, %v486_v59 }
  0xd6   : > { %v471_v1 = vadd.f32 %v470_v63, %v469_v61  ;;  %v494_v2 = vrot.slane %v493_v0, 4 }
  0xd8   : > { %v472_v3 = vrot.slane %v471_v1, 2  ;;  %v495_v4 = vadd.f32 %v494_v2, %v493_v0 }
  0xda   : > { %v473_v5 = vadd.f32 %v472_v3, %v471_v1  ;;  %v496_v6 = vrot.slane %v495_v4, 2 }
  0xdc   : > { %v474_v7 = vrot.slane %v473_v5, 1  ;;  %v497_v8 = vadd.f32 %v496_v6, %v495_v4 }
  0xde   : > { %v475_v10 = vadd.f32 %v474_v7, %v473_v5  ;;  %v498_v11 = vrot.slane %v497_v8, 1 }
  0xe0   : > { %v476_v13 = vadd.f32 %v475_v10, %v462_v9  ;;  %v499_v14 = vadd.f32 %v498_v11, %v497_v8 }
  0xe2   : > { %477 = vst [vmem:[#allocation2] sm:$0x1] %v476_v13  ;;  %v500_v15 = vadd.f32 %v499_v14, %v478_v12 }
  0xe4   : > { %501 = vst [vmem:[#allocation3] sm:$0x1] %v500_v15 }
  0xe5 PF: > { %p756_p8 = scmp.ne.s32.totalorder %s1078_s24, 1 }
  0xe7   : > { %505 = sbr.rel (%p756_p8) target bundleno = 420 (0x1a4), region = 72 }
  0xec   : > { %v583_v16 = vld [vmem:[#allocation9 + $0x78] sm:$0xff]  ;;  %v582_v17 = vld [vmem:[#allocation9 + $0x70] sm:$0xff]  ;;  %v581_v18 = vld [vmem:[#allocation9 + $0x68] sm:$0xff] }
  0xed   : > { %810 = vmatpush.msra.mxu2 %v583_v16  ;;  %811 = vmatpush.msra.mxu3 %v583_v16  ;;  %v580_v19 = vld [vmem:[#allocation9 + $0x60] sm:$0xff]  ;;  %v506_v20 = vld [vmem:[#allocation2] sm:$0x1]  ;;  %v508_v21 = vld [vmem:[#allocation3] sm:$0x1] }
  0xee   : > { %588 = vmatpush.msra.mxu0 %v583_v16  ;;  %809 = vmatpush.msra.mxu1 %v583_v16  ;;  %v579_v22 = vld [vmem:[#allocation9 + $0x58] sm:$0xff]  ;;  %v1247_v23 = vmul.f32 0.015625, %v506_v20  ;;  %v509_v24 = vmul.f32 0.015625, %v508_v21  ;;  %v578_v25 = vld [vmem:[#allocation9 + $0x50] sm:$0xff]  ;;  %v577_v29 = vld [vmem:[#allocation9 + $0x48] sm:$0xff] }
  0xef   : > { %813 = vmatpush.msra.mxu2 %v582_v17  ;;  %814 = vmatpush.msra.mxu3 %v582_v17  ;;  %v576_v33 = vld [vmem:[#allocation9 + $0x40] sm:$0xff]  ;;  %v575_v37 = vld [vmem:[#allocation9 + $0x38] sm:$0xff]  ;;  %v574_v41 = vld [vmem:[#allocation9 + $0x30] sm:$0xff] }
  0xf0   : > { %589 = vmatpush.msra.mxu0 %v582_v17  ;;  %812 = vmatpush.msra.mxu1 %v582_v17  ;;  %v510_v26 = vmul.f32 %v1247_v23, %v1247_v23  ;;  %v573_v42 = vld [vmem:[#allocation9 + $0x28] sm:$0xff]  ;;  %v572_v43 = vld [vmem:[#allocation9 + $0x20] sm:$0xff]  ;;  %v571_v45 = vld [vmem:[#allocation9 + $0x18] sm:$0xff]  ;;  %v525_v53 = vperm.slane %v1247_v23, 0 }
  0xf1   : > { %816 = vmatpush.msra.mxu2 %v581_v18  ;;  %817 = vmatpush.msra.mxu3 %v581_v18  ;;  %v570_v47 = vld [vmem:[#allocation9 + $0x10] sm:$0xff]  ;;  %v569_v49 = vld [vmem:[#allocation9 + $0x8] sm:$0xff]  ;;  %v568_v51 = vld [vmem:[#allocation9] sm:$0xff] }
  0xf2   : > { %590 = vmatpush.msra.mxu0 %v581_v18  ;;  %815 = vmatpush.msra.mxu1 %v581_v18  ;;  %v511_v30 = vsub.f32 %v509_v24, %v510_v26  ;;  %v535_v55 = vld [vmem:[%s1289_s3] sm:$0x1]  ;;  %v531_v57 = vsub.f32 %v1209_v31, %v525_v53  ;;  %v533_v59 = vsub.f32 %v1211_v32, %v525_v53 }
  0xf3   : > { %819 = vmatpush.msra.mxu2 %v580_v19  ;;  %820 = vmatpush.msra.mxu3 %v580_v19  ;;  %v527_v60 = vsub.f32 %v1205_v27, %v525_v53  ;;  %v529_v61 = vsub.f32 %v1207_v28, %v525_v53  ;;  %v532_v62 = vsub.f32 %v1217_v39, %v525_v53  ;;  %v930_v1 = vld [vmem:[%s1290_s4] ss:$0 sm:$0xff] }
  0xf4   : > { %591 = vmatpush.msra.mxu0 %v580_v19  ;;  %818 = vmatpush.msra.mxu1 %v580_v19  ;;  %v512_v34 = vmax.f32 %v511_v30, 0.0  ;;  %v534_v63 = vsub.f32 %v1219_v40, %v525_v53  ;;  %v528_v2 = vsub.f32 %v1213_v35, %v525_v53  ;;  %v530_v31 = vsub.f32 %v1215_v36, %v525_v53  ;;  %v931_v20 = vld [vmem:[%s1292_s6] ss:$0 sm:$0xff] }
  0xf5   : > { %822 = vmatpush.msra.mxu2 %v579_v22  ;;  %823 = vmatpush.msra.mxu3 %v579_v22 }
  0xf6   : > { %592 = vmatpush.msra.mxu0 %v579_v22  ;;  %821 = vmatpush.msra.mxu1 %v579_v22  ;;  %v513_v38 = vadd.f32 1e-05, %v512_v34 }
  0xf7   : > { %825 = vmatpush.msra.mxu2 %v578_v25  ;;  %826 = vmatpush.msra.mxu3 %v578_v25 }
  0xf8   : > { %593 = vmatpush.msra.mxu0 %v578_v25  ;;  %824 = vmatpush.msra.mxu1 %v578_v25  ;;  %932 = vrsqrt.f32 %v513_v38  ;;  %vm520_vm0 = vweird.f32 %v513_v38 }
  0xf9   : > { %828 = vmatpush.msra.mxu2 %v577_v29  ;;  %829 = vmatpush.msra.mxu3 %v577_v29 }
  0xfa   : > { %594 = vmatpush.msra.mxu0 %v577_v29  ;;  %827 = vmatpush.msra.mxu1 %v577_v29 }
  0xfb   : > { %831 = vmatpush.msra.mxu2 %v576_v33  ;;  %832 = vmatpush.msra.mxu3 %v576_v33 }
  0xfc   : > { %595 = vmatpush.msra.mxu0 %v576_v33  ;;  %830 = vmatpush.msra.mxu1 %v576_v33 }
  0xfd   : > { %834 = vmatpush.msra.mxu2 %v575_v37  ;;  %835 = vmatpush.msra.mxu3 %v575_v37 }
  0xfe   : > { %596 = vmatpush.msra.mxu0 %v575_v37  ;;  %833 = vmatpush.msra.mxu1 %v575_v37  ;;  %v933_v44 = vpop.eup %932 }
  0xff   : > { %837 = vmatpush.msra.mxu2 %v574_v41  ;;  %838 = vmatpush.msra.mxu3 %v574_v41  ;;  %v515_v46 = vmul.f32 %v933_v44, %v513_v38  ;;  %vm521_vm1 = vweird.f32 %v933_v44 }
 0x100   : > { %597 = vmatpush.msra.mxu0 %v574_v41  ;;  %836 = vmatpush.msra.mxu1 %v574_v41  ;;  %vm522_vm2 = vmor %vm520_vm0, %vm521_vm1 }
 0x101   : > { %840 = vmatpush.msra.mxu2 %v573_v42  ;;  %841 = vmatpush.msra.mxu3 %v573_v42  ;;  %v516_v48 = vmul.f32 %v933_v44, %v515_v46 }
 0x102   : > { %598 = vmatpush.msra.mxu0 %v573_v42  ;;  %839 = vmatpush.msra.mxu1 %v573_v42 }
 0x103   : > { %843 = vmatpush.msra.mxu2 %v572_v43  ;;  %844 = vmatpush.msra.mxu3 %v572_v43  ;;  %v517_v50 = vmul.f32 0.5, %v516_v48 }
 0x104   : > { %599 = vmatpush.msra.mxu0 %v572_v43  ;;  %842 = vmatpush.msra.mxu1 %v572_v43 }
 0x105   : > { %846 = vmatpush.msra.mxu2 %v571_v45  ;;  %847 = vmatpush.msra.mxu3 %v571_v45  ;;  %v518_v52 = vsub.f32 1.5, %v517_v50 }
 0x106   : > { %600 = vmatpush.msra.mxu0 %v571_v45  ;;  %845 = vmatpush.msra.mxu1 %v571_v45 }
 0x107   : > { %849 = vmatpush.msra.mxu2 %v570_v47  ;;  %850 = vmatpush.msra.mxu3 %v570_v47  ;;  %v519_v54 = vmul.f32 %v933_v44, %v518_v52 }
 0x108   : > { %601 = vmatpush.msra.mxu0 %v570_v47  ;;  %848 = vmatpush.msra.mxu1 %v570_v47 }
 0x109   : > { %852 = vmatpush.msra.mxu2 %v569_v49  ;;  %853 = vmatpush.msra.mxu3 %v569_v49  ;;  %v523_v56 = vsel %vm522_vm2, %v933_v44, %v519_v54 }
 0x10a   : > { %602 = vmatpush.msra.mxu0 %v569_v49  ;;  %851 = vmatpush.msra.mxu1 %v569_v49  ;;  %v536_v58 = vmul.f32 %v535_v55, %v523_v56 }
 0x10b   : > { %855 = vmatpush.msra.mxu2 %v568_v51  ;;  %856 = vmatpush.msra.mxu3 %v568_v51 }
 0x10c   : > { %603 = vmatpush.msra.mxu0 %v568_v51  ;;  %854 = vmatpush.msra.mxu1 %v568_v51  ;;  %v538_v0 = vperm.slane %v536_v58, 0 }
 0x10e   : > { %v544_v3 = vmul.f32 %v538_v0, %v531_v57  ;;  %v546_v4 = vmul.f32 %v538_v0, %v533_v59  ;;  %v540_v32 = vmul.f32 %v538_v0, %v527_v60  ;;  %v542_v5 = vmul.f32 %v538_v0, %v529_v61 }
 0x10f   : > { %v545_v27 = vmul.f32 %v538_v0, %v532_v62  ;;  %v547_v6 = vmul.f32 %v538_v0, %v534_v63  ;;  %v541_v40 = vmul.f32 %v538_v0, %v528_v2  ;;  %v543_v9 = vmul.f32 %v538_v0, %v530_v31 }
 0x110   : > { %v556_v28 = vadd.f32 %v930_v1, %v544_v3  ;;  %v558_v7 = vadd.f32 %v930_v1, %v546_v4  ;;  %v552_v39 = vadd.f32 %v930_v1, %v540_v32  ;;  %v554_v8 = vadd.f32 %v930_v1, %v542_v5 }
 0x111   : > { %v557_v35 = vadd.f32 %v930_v1, %v545_v27  ;;  %v559_v36 = vadd.f32 %v930_v1, %v547_v6  ;;  %v553_v14 = vadd.f32 %v930_v1, %v541_v40  ;;  %v555_v15 = vadd.f32 %v930_v1, %v543_v9 }
 0x112   : > { %v564_v10 = vmax.f32 %v556_v28, 0.0  ;;  %v566_v11 = vmax.f32 %v558_v7, 0.0  ;;  %v560_v12 = vmax.f32 %v552_v39, 0.0  ;;  %v562_v13 = vmax.f32 %v554_v8, 0.0 }
 0x113   : > { %v565_v16 = vmax.f32 %v557_v35, 0.0  ;;  %v567_v17 = vmax.f32 %v559_v36, 0.0  ;;  %v561_v18 = vmax.f32 %v553_v14, 0.0  ;;  %v563_v19 = vmax.f32 %v555_v15, 0.0 }
 0x114   : > { %616 = vmatmul.f32.vlgmr.msra.gmra.mxu2 %v564_v10  ;;  %622 = vmatmul.f32.vlgmr.msra.gmra.mxu3 %v566_v11 }
 0x115   : > { %604 = vmatmul.f32.vlgmr.msra.gmra.mxu0 %v560_v12  ;;  %610 = vmatmul.f32.vlgmr.msra.gmra.mxu1 %v562_v13 }
 0x11c   : > { %619 = vmatmul.f32.gmra.mxu2 %v565_v16  ;;  %625 = vmatmul.f32.gmra.mxu3 %v567_v17 }
 0x11d   : > { %607 = vmatmul.f32.gmra.mxu0 %v561_v18  ;;  %613 = vmatmul.f32.gmra.mxu1 %v563_v19 }
 0x192   : > { %v605_v21 = vpop.f32.mrf.mxu0  ;;  %v611_v22 = vpop.f32.mrf.mxu1 }
 0x193   : > { %v606_v23 = vadd.f32 %v931_v20, %v605_v21  ;;  %v612_v24 = vadd.f32 %v931_v20, %v611_v22 }
 0x195   : > { %629 = vst [vmem:[#allocation10] sm:$0xff] %v606_v23 }
 0x196   : > { %631 = vst [vmem:[#allocation10 + $0x10] sm:$0xff] %v612_v24 }
 0x197   : > { %v617_v25 = vpop.f32.mrf.mxu2  ;;  %v623_v26 = vpop.f32.mrf.mxu3 }
 0x198   : > { %v618_v29 = vadd.f32 %v931_v20, %v617_v25  ;;  %v624_v30 = vadd.f32 %v931_v20, %v623_v26 }
 0x19a   : > { %633 = vst [vmem:[#allocation10 + $0x20] sm:$0xff] %v618_v29  ;;  %v608_v33 = vpop.f32.mrf.mxu0  ;;  %v614_v34 = vpop.f32.mrf.mxu1 }
 0x19b   : > { %635 = vst [vmem:[#allocation10 + $0x30] sm:$0xff] %v624_v30  ;;  %v609_v37 = vadd.f32 %v931_v20, %v608_v33  ;;  %v615_v38 = vadd.f32 %v931_v20, %v614_v34 }
 0x19d   : > { %630 = vst [vmem:[#allocation10 + $0x8] sm:$0xff] %v609_v37 }
 0x19e   : > { %632 = vst [vmem:[#allocation10 + $0x18] sm:$0xff] %v615_v38 }
 0x19f   : > { %v620_v41 = vpop.f32.mrf.mxu2  ;;  %v626_v42 = vpop.f32.mrf.mxu3 }
 0x1a0   : > { %v621_v43 = vadd.f32 %v931_v20, %v620_v41  ;;  %v627_v44 = vadd.f32 %v931_v20, %v626_v42 }
 0x1a2   : > { %634 = vst [vmem:[#allocation10 + $0x28] sm:$0xff] %v621_v43 }
 0x1a3   : > { %636 = vst [vmem:[#allocation10 + $0x38] sm:$0xff] %v627_v44 }
 0x1a4 PF: > { %p893_p9 = scmp.eq.s32.totalorder %s745_s27, 1  ;;  %s653_s19 = sshll.u32 %s1293_s7, 4  ;;  %s654_s19 = int_to_ptr.hbm [resolvable:$true] %s653_s19 }
 0x1a5   : > { %s1094_s20 = smov [#allocation10]   ;;  %s1095_s22 = smov 128  }
 0x1a6   : > { %s651_s21 = sshll.u32 %s1094_s20, 4  ;;  %s1096_s23 = smov 8   ;;  %s652_s21 = int_to_ptr.vmem [resolvable:$true] %s651_s21 }
 0x1a7   : > { %870 = dma.vmem_to_hbm [thread:$0]  (%p893_p9), %s652_s21, 1024, %s654_s19, [#allocation6], %s1095_s22, %s1095_s22, %s1096_s23  }
 0x1a8 PF: > { %p894_p10 = scmp.ge.s32.totalorder %s1086_s26, 2  ;;  %p895_p11 = scmp.eq.s32.totalorder %s746_s28, 1 }
 0x1aa   : > { %p884_p12 = pnand %p895_p11, %p894_p10 }
 0x1ac   : > { %p885_p13 = pneg %p884_p12 }
 0x1ae   : > { %1073 = dma.done.wait (%p885_p13), [#allocation6], 1024  }
 0x1af   : > { %1075 = vsyncadd (%p885_p13), [#allocation6], 4294966272  ;;  %s22_s26 = sadd.s32 1, %s1086_s26   ;;  %s1297_s24 = smov %s1082_s25 }
 0x1b0   : > { %p19_p0 = scmp.ge.s32.totalorder %s22_s26, 4   ;;  %s1298_s25 = smov %s1300_s14 }
 0x1b2   :  { %21 = sbr.rel (!%p19_p0) target bundleno = 5 (0x5), region = 106 }
 0x1b7   :  { %675 = vsyncpa [#allocation5], 1 }
 0x1b8   :  { %677 = vsyncpa [#allocation5 + $0x1], 1 }
 0x1b9   :  { %678 = vsyncpa [#allocation8], 1 }
 0x1ba   :  { %679 = vsyncpa [#allocation6], 1 }
 0x1bb   :  { %681 = vsyncpa [#allocation6 + $0x1], 1 }

</bundles_post_ra>
